<compile_context>
chip_gen: v5e
topology: v5e:2x2
jax: 0.10.0
libtpu: 0.0.40
codegen_flags: <defaults>
</compile_context>

<pallas_src>
import jax
import jax.numpy as jnp
from jax.experimental import pallas as pl
from jax.experimental.pallas import tpu as pltpu

_LANE = 128
_SMALL_BYTES = 512 * 1024          # per-array whole-in-VMEM fast-path threshold
_TARGET_BLOCK_BYTES = 1 << 20      # ~1 MiB of data per block on gridded paths
_RAGGED_COL_TILE = 64 * 1024       # lane-dim tile for the rare non-128-divisible case


def _cdiv(a, b):
    return -(-a // b)


def _round_up(a, b):
    return _cdiv(a, b) * b


def _add_relu_kernel(a_ref, b_ref, o_ref):
    # Pure VPU elementwise work on the whole VMEM tile.
    s = a_ref[...] + b_ref[...]
    o_ref[...] = jnp.maximum(s, jnp.zeros_like(s)).astype(o_ref.dtype)


def _whole_array_call(a2, b2):
    """Single block fully resident in VMEM; no grid / pipeline overhead."""
    return pl.pallas_call(
        _add_relu_kernel,
        out_shape=jax.ShapeDtypeStruct(a2.shape, a2.dtype),
        in_specs=[
            pl.BlockSpec(memory_space=pltpu.MemorySpace.VMEM),
            pl.BlockSpec(memory_space=pltpu.MemorySpace.VMEM),
        ],
        out_specs=pl.BlockSpec(memory_space=pltpu.MemorySpace.VMEM),
        compiler_params=pltpu.CompilerParams(
            vmem_limit_bytes=16 * 1024 * 1024,
        ),
    )(a2, b2)


def _gridded_rows_call(a2, b2, tile_rows):
    """(rows, 128) slab tiled along rows; double-buffered, megacore-parallel."""
    rows, lanes = a2.shape
    grid = (_cdiv(rows, tile_rows),)   # ragged final row-block masked by Pallas
    return pl.pallas_call(
        _add_relu_kernel,
        out_shape=jax.ShapeDtypeStruct(a2.shape, a2.dtype),
        grid=grid,
        in_specs=[
            pl.BlockSpec((tile_rows, lanes), lambda i: (i, 0)),
            pl.BlockSpec((tile_rows, lanes), lambda i: (i, 0)),
        ],
        out_specs=pl.BlockSpec((tile_rows, lanes), lambda i: (i, 0)),
        compiler_params=pltpu.CompilerParams(
            dimension_semantics=("parallel",),
            vmem_limit_bytes=32 * 1024 * 1024,
        ),
    )(a2, b2)


def _gridded_cols_call(a2, b2, tile_cols):
    """(1, n) slab tiled along lanes for non-128-divisible element counts."""
    _, n = a2.shape
    grid = (_cdiv(n, tile_cols),)      # ragged final lane-block masked by Pallas
    return pl.pallas_call(
        _add_relu_kernel,
        out_shape=jax.ShapeDtypeStruct(a2.shape, a2.dtype),
        grid=grid,
        in_specs=[
            pl.BlockSpec((1, tile_cols), lambda i: (0, i)),
            pl.BlockSpec((1, tile_cols), lambda i: (0, i)),
        ],
        out_specs=pl.BlockSpec((1, tile_cols), lambda i: (0, i)),
        compiler_params=pltpu.CompilerParams(
            dimension_semantics=("parallel",),
            vmem_limit_bytes=32 * 1024 * 1024,
        ),
    )(a2, b2)


def add_relu(x478, x470):
    """relu(x478 + x470); arbitrary (e.g. NCHW) shape in / same shape out."""
    assert x478.shape == x470.shape and x478.dtype == x470.dtype
    orig_shape = x478.shape
    dtype = x478.dtype
    n = x478.size
    itemsize = jnp.dtype(dtype).itemsize
    slab_bytes = n * itemsize

    a = x478.reshape(-1)   # free contiguous reshape; NO padding, NO copies
    b = x470.reshape(-1)

    if n % _LANE == 0:
        rows = n // _LANE
        a2 = a.reshape(rows, _LANE)
        b2 = b.reshape(rows, _LANE)
        if slab_bytes <= _SMALL_BYTES:
            out2 = _whole_array_call(a2, b2)
        else:
            # Dtype-native packed sublane tile: 8 (f32) / 16 (bf16) / 32 (int8).
            sublane = max(8, 32 // itemsize)
            tile_rows_max = _round_up(
                max(sublane, _TARGET_BLOCK_BYTES // (_LANE * itemsize)), sublane)
            nblocks = max(2, _cdiv(rows, tile_rows_max))
            if nblocks % 2:
                nblocks += 1           # even block count keeps both v7x TCs balanced
            tile_rows = min(tile_rows_max,
                            _round_up(_cdiv(rows, nblocks), sublane))
            out2 = _gridded_rows_call(a2, b2, tile_rows)
    else:
        # Rare: element count not a multiple of 128. Keep lane-major (1, n)
        # and let Pallas mask the ragged final lane block — still no padding.
        a2 = a.reshape(1, n)
        b2 = b.reshape(1, n)
        if slab_bytes <= _SMALL_BYTES:
            out2 = _whole_array_call(a2, b2)
        else:
            out2 = _gridded_cols_call(a2, b2, _RAGGED_COL_TILE)

    return out2.reshape(orig_shape)


if __name__ == "__main__":
    key = jax.random.PRNGKey(0)
    k = jax.random.split(key, 8)

    # 1) Module's actual shape (1, 1024, 14, 14): 128-divisible, >512 KiB
    #    -> gridded row path with grid=(2,) (both v7x TCs used).
    x478 = jax.random.normal(k[0], (1, 1024, 14, 14), dtype=jnp.float32)
    x470 = jax.random.normal(k[1], (1, 1024, 14, 14), dtype=jnp.float32)
    out = add_relu(x478, x470)
    jax.block_until_ready(out)
    ref = jnp.maximum(x478 + x470, 0.0)
    assert out.shape == ref.shape
    assert jnp.allclose(out, ref, atol=1e-6), "mismatch vs reference (module shape)"

    # 2) Tiny non-128-divisible shape -> whole-array (1, n) fast path, no padding.
    xa = jax.random.normal(k[2], (2, 3, 7, 5), dtype=jnp.float32)
    xb = jax.random.normal(k[3], (2, 3, 7, 5), dtype=jnp.float32)
    out_b = add_relu(xa, xb)
    jax.block_until_ready(out_b)
    assert jnp.allclose(out_b, jnp.maximum(xa + xb, 0.0), atol=1e-6), \
        "mismatch vs reference (small ragged path)"

    # 3) Larger non-128-divisible shape -> lane-tiled grid path with ragged last block.
    xc = jax.random.normal(k[4], (3, 7, 97, 89), dtype=jnp.float32)
    xd = jax.random.normal(k[5], (3, 7, 97, 89), dtype=jnp.float32)
    out_c = add_relu(xc, xd)
    jax.block_until_ready(out_c)
    assert jnp.allclose(out_c, jnp.maximum(xc + xd, 0.0), atol=1e-6), \
        "mismatch vs reference (large ragged path)"

    # 4) bf16, 128-divisible, >512 KiB -> dtype-aware (16-row aligned) gridded path.
    xe = jax.random.normal(k[6], (1, 1024, 18, 18), dtype=jnp.bfloat16)
    xf = jax.random.normal(k[7], (1, 1024, 18, 18), dtype=jnp.bfloat16)
    out_d = add_relu(xe, xf)
    jax.block_until_ready(out_d)
    ref_d = jnp.maximum(xe + xf, jnp.bfloat16(0))
    assert jnp.allclose(out_d.astype(jnp.float32), ref_d.astype(jnp.float32),
                        atol=1e-2), "mismatch vs reference (bf16 path)"

    print("KERNEL_OK")
</pallas_src>

<mosaic_0001>
module attributes {stable_mosaic.version = 11 : i64} {
  func.func @_add_relu_kernel(%arg0: i32, %arg1: memref<784x128xf32, #tpu.memory_space<vmem>>, %arg2: memref<784x128xf32, #tpu.memory_space<vmem>>, %arg3: memref<784x128xf32, #tpu.memory_space<vmem>>) attributes {dimension_semantics = [#tpu.dimension_semantics<parallel>], iteration_bounds = array<i64: 2>, scalar_prefetch = 0 : i64, scratch_operands = 0 : i64, tpu.core_type = #tpu.core_type<tc>, window_params = [{transform_indices = @transform_0, window_bounds = array<i64: 784, 128>}, {transform_indices = @transform_1, window_bounds = array<i64: 784, 128>}, {transform_indices = @transform_2, window_bounds = array<i64: 784, 128>}]} {
    %c0 = arith.constant 0 : index
    %c0_0 = arith.constant 0 : index
    %0 = vector.load %arg1[%c0, %c0_0] : memref<784x128xf32, #tpu.memory_space<vmem>>, vector<784x128xf32>
    %c0_1 = arith.constant 0 : index
    %c0_2 = arith.constant 0 : index
    %1 = vector.load %arg2[%c0_1, %c0_2] : memref<784x128xf32, #tpu.memory_space<vmem>>, vector<784x128xf32>
    %2 = arith.addf %0, %1 : vector<784x128xf32>
    %cst = arith.constant 0.000000e+00 : f32
    %3 = vector.broadcast %cst : f32 to vector<784x128xf32>
    %4 = arith.maximumf %2, %3 : vector<784x128xf32>
    %c0_3 = arith.constant 0 : index
    %c0_4 = arith.constant 0 : index
    %5 = vector.load %arg3[%c0_3, %c0_4] : memref<784x128xf32, #tpu.memory_space<vmem>>, vector<784x128xf32>
    tpu.vector_store %arg3[%c0_3, %c0_4], %4 {strides = array<i32>} : memref<784x128xf32, #tpu.memory_space<vmem>>, vector<784x128xf32>,
    return
  }
  func.func @transform_0(%arg0: i32) -> (i32, i32) {
    %c0_i32 = arith.constant 0 : i32
    %c0_i32_0 = arith.constant 0 : i32
    return %arg0, %c0_i32 : i32, i32
  }
  func.func @transform_1(%arg0: i32) -> (i32, i32) {
    %c0_i32 = arith.constant 0 : i32
    %c0_i32_0 = arith.constant 0 : i32
    return %arg0, %c0_i32 : i32, i32
  }
  func.func @transform_2(%arg0: i32) -> (i32, i32) {
    %c0_i32 = arith.constant 0 : i32
    %c0_i32_0 = arith.constant 0 : i32
    return %arg0, %c0_i32 : i32, i32
  }
}

</mosaic_0001>

<bundles_post_ra>
// kernel: tpu_custom_call.1
= control target key start
LH: loop header
LB: loop body
LE: loop exit
PB: predicated region body
PF: predicated region fallthrough
CT: control target
= control target key end

     0   :  { %7 = vsyncpa [#allocation3], 0  ;;  %s1496_s0 = inlined_call_operand.hbm [shape: f32[1568,128], index: 0, kind: input, shape index: {}]   ;;  %s1497_s1 = inlined_call_operand.hbm [shape: f32[1568,128], index: 1, kind: input, shape index: {}]   ;;  %s1498_s2 = inlined_call_operand.hbm [shape: f32[1568,128], index: 2, kind: output, shape index: {}]  }
   0x1   :  { %9 = vsyncpa [#allocation3 + $0x1], 0 }
   0x2   :  { %10 = vsyncpa [#allocation6], 0 }
   0x3   :  { %12 = vsyncpa [#allocation6 + $0x1], 0 }
   0x4   :  { %13 = vsyncpa [#allocation4], 0 }
   0x5   :  { %15 = vsyncpa [#allocation4 + $0x1], 0  ;;  %s1032_s9 = smov 0   ;;  %s1034_s10 = smov 0  }
   0x6   :  { %s1036_s11 = smov 0   ;;  %s1038_s12 = smov 0  }
   0x7 LB: > { %s1053_s13 = sadd.s32 4294967295, %s1011_s12   ;;  %s811_s14 = sadd.s32 4294967294, %s1011_s12   ;;  %s1011_s12 = sphi %s1038_s12, %s1507_s12   ;;  %s1007_s11 = sphi %s1036_s11, %s1506_s11   ;;  %s1003_s10 = sphi %s1034_s10, %s1505_s10   ;;  %s999_s9 = sphi %s1032_s9, %s1504_s9  }
   0x8   : > { %s1057_s15 = sadd.s32 1, %s1011_s12   ;;  %s28_s16 = sadd.s32 1, %s1007_s11 }
   0x9   : > { %s25_s17 = ssub.s32 %s1011_s12, %s1057_s15  ;;  %p35_p0 = scmp.ne.s32.totalorder %s1007_s11, %s1003_s10 }
   0xa   : > { %p26_p1 = scmp.eq.s32.totalorder %s25_s17, 0  ;;  %p36_p2 = scmp.eq.s32.totalorder %s1011_s12, 0 }
   0xb   : > { %p41_p3 = scmp.ne.s32.totalorder %s1003_s10, %s999_s9  ;;  %p42_p4 = scmp.eq.s32.totalorder %s1053_s13, 0 }
   0xc   : > { %s1069_s18 = scalar_select %p26_p1, %s1007_s11, %s28_s16  }
   0xd   : > { %p37_p5 = por %p36_p2, %p35_p0  ;;  %p1071_p6 = por %p42_p4, %p41_p3 }
   0xe   : > { %p91_p7 = scmp.eq.s32.totalorder %s1053_s13, 1  ;;  %p97_p8 = scmp.eq.s32.totalorder %s811_s14, 1 }
   0xf   : > { %p813_p9 = scmp.ge.s32.totalorder %s1011_s12, 2  ;;  %p843_p10 = scmp.lt.s32.totalorder %s1011_s12, 2 }
  0x10   : > { %p1078_p11 = por %p91_p7, %p35_p0  ;;  %p1082_p12 = por %p97_p8, %p41_p3 }
  0x11   : > { %s1087_s22 = sand.u32 1, %s1007_s11   ;;  %s820_s23 = smul.u32 784, %s1011_s12 }
  0x12   : > { %s823_s24 = smul.u32 784, %s1087_s22  ;;  %p1096_p13 = pnand %p843_p10, %p37_p5 }
  0x13   : > { %s126_s27 = scalar_lea.hbm %s1496_s0, %s820_s23  ;;  %s118_s4 = scalar_lea.sflag [#allocation3], %s1087_s22 }
  0x14   : > { %s127_s29 = sshll.u32 %s126_s27, 4  ;;  %s121_s30 = scalar_lea.vmem [#allocation2], %s823_s24  ;;  %s128_s29 = int_to_ptr.hbm [resolvable:$true] %s127_s29 }
  0x15   : > { %s129_s3 = sshll.u32 %s121_s30, 4  ;;  %s881_s5 = sshra.s32 %s128_s29, 4  ;;  %s130_s3 = int_to_ptr.vmem [resolvable:$true] %s129_s3  ;;  %s882_s5 = int_to_ptr.hbm [resolvable:$true] %s881_s5 }
  0x16   : > { %s883_s6 = scalar_lea.hbm %s882_s5, 784  ;;  %p885_p1 = pneg %p1096_p13 }
  0x17   : > { %p884_p0 = scmp.ne.s32.totalorder %s882_s5, %s883_s6  ;;  %s888_s14 = scalar_lea.hbm %s1496_s0, 1568 }
  0x18   : > { %p889_p4 = scmp.lt.s32.totalorder %s882_s5, %s1496_s0  ;;  %p890_p5 = scmp.lt.s32.totalorder %s888_s14, %s883_s6 }
  0x19   : > { %p886_p2 = pnand %p885_p1, %p884_p0 }
  0x1a   : > { %p891_p7 = por %p890_p5, %p889_p4 }
  0x1b   : > { %p887_p3 = pneg %p886_p2 }
  0x1d   : > { %p892_p8 = pnand %p891_p7, %p887_p3 }
  0x1f   : > { %895 = shalt.err (!%p892_p8)
}
  0x20   : > { %s1013_s25 = smov 128   ;;  %s1014_s26 = smov 8  }
  0x21   : > { %835 = dma.hbm_to_vmem [thread:$0]  (!%p1096_p13), %s128_s29, 12544, %s130_s3, %s118_s4, %s1013_s25, %s1013_s25, %s1014_s26  }
  0x22   : > { %p816_p10 = scmp.ge.s32.totalorder %s1011_s12, 1  ;;  %p159_p0 = scmp.lt.s32.totalorder %s1011_s12, 3 }
  0x23   : > { %s148_s6 = scalar_lea.hbm %s1497_s1, %s820_s23  ;;  %s143_s8 = scalar_lea.vmem [#allocation5], %s823_s24 }
  0x24   : > { %p1118_p2 = pnand %p816_p10, %p159_p0  ;;  %s149_s7 = sshll.u32 %s148_s6, 4  ;;  %s150_s7 = int_to_ptr.hbm [resolvable:$true] %s149_s7 }
  0x25   : > { %s151_s14 = sshll.u32 %s143_s8, 4  ;;  %s140_s16 = scalar_lea.sflag [#allocation6], %s1087_s22  ;;  %s152_s14 = int_to_ptr.vmem [resolvable:$true] %s151_s14 }
  0x26   : > { %s911_s17 = sshra.s32 %s150_s7, 4  ;;  %s918_s30 = scalar_lea.hbm %s1497_s1, 1568  ;;  %s912_s17 = int_to_ptr.hbm [resolvable:$true] %s911_s17 }
  0x27   : > { %s913_s29 = scalar_lea.hbm %s912_s17, 784  ;;  %p919_p7 = scmp.lt.s32.totalorder %s912_s17, %s1497_s1 }
  0x28   : > { %p914_p3 = scmp.ne.s32.totalorder %s912_s17, %s913_s29  ;;  %p920_p8 = scmp.lt.s32.totalorder %s918_s30, %s913_s29 }
  0x2a   : > { %p916_p4 = pnand %p914_p3, %p885_p1  ;;  %p921_p10 = por %p920_p8, %p919_p7 }
  0x2c   : > { %p917_p5 = pneg %p916_p4 }
  0x2e   : > { %p922_p0 = pnand %p921_p10, %p917_p5 }
  0x30   : > { %925 = shalt.err (!%p922_p0)
}
  0x31   : > { %838 = dma.hbm_to_vmem [thread:$0]  (!%p1096_p13), %s150_s7, 12544, %s152_s14, %s140_s16, %s1013_s25, %s1013_s25, %s1014_s26  }
  0x32   : > { %163 = sbr.rel (%p1118_p2) target bundleno = 165 (0xa5), region = 28  ;;  %s1144_s22 = sand.u32 (!%p1118_p2), 1, %s1003_s10  }
  0x33   : > { %s1147_s24 = smul.u32 (!%p1118_p2), 784, %s1144_s22  ;;  %s166_s6 = scalar_lea.sflag (!%p1118_p2), [#allocation3], %s1144_s22 }
  0x35   : > { %s1151_s8 = scalar_lea.vmem (!%p1118_p2), [#allocation2], %s1147_s24 }
  0x37   : > { %986 = dma.done.wait (%p1071_p6), %s166_s6, 12544  }
  0x38   : > { %988 = vsyncadd (%p1071_p6), %s166_s6, 4294954752  ;;  %s176_s28 = scalar_lea.sflag [#allocation6], %s1144_s22  ;;  %s1159_s25 = scalar_lea.vmem [#allocation5], %s1147_s24 }
  0x39   : > { %990 = dma.done.wait (%p1071_p6), %s176_s28, 12544  }
  0x3a   : > { %992 = vsyncadd (%p1071_p6), %s176_s28, 4294954752  ;;  %v209_v0 = vld [vmem:[%s1151_s8] sm:$0xff]  ;;  %v210_v2 = vld [vmem:[%s1151_s8 + $0x8] sm:$0xff]  ;;  %s1181_s19 = scalar_lea.vmem [#allocation7], %s1147_s24  ;;  %s822_s26 = smul.u32 784, %s1053_s13 }
  0x3b   : > { %v307_v1 = vld [vmem:[%s1159_s25] sm:$0xff]  ;;  %v308_v4 = vld [vmem:[%s1159_s25 + $0x8] sm:$0xff]  ;;  %v211_v5 = vld [vmem:[%s1151_s8 + $0x10] sm:$0xff]  ;;  %s712_s14 = sshll.u32 %s1181_s19, 4  ;;  %s700_s17 = scalar_lea.sflag [#allocation4], %s1144_s22  ;;  %s713_s14 = int_to_ptr.vmem [resolvable:$true] %s712_s14 }
  0x3c   : > { %v405_v3 = vadd.f32 %v307_v1, %v209_v0  ;;  %v309_v6 = vld [vmem:[%s1159_s25 + $0x10] sm:$0xff]  ;;  %v406_v7 = vadd.f32 %v308_v4, %v210_v2  ;;  %v212_v9 = vld [vmem:[%s1151_s8 + $0x18] sm:$0xff]  ;;  %v213_v11 = vld [vmem:[%s1151_s8 + $0x20] sm:$0xff]  ;;  %s711_s7 = scalar_lea.hbm %s1498_s2, %s822_s26  ;;  %s961_s23 = scalar_lea.hbm %s1498_s2, 1568 }
  0x3d   : > { %v407_v8 = vadd.f32 %v309_v6, %v211_v5  ;;  %v310_v10 = vld [vmem:[%s1159_s25 + $0x18] sm:$0xff]  ;;  %v311_v14 = vld [vmem:[%s1159_s25 + $0x20] sm:$0xff]  ;;  %v214_v15 = vld [vmem:[%s1151_s8 + $0x28] sm:$0xff]  ;;  %s714_s16 = sshll.u32 %s711_s7, 4  ;;  %s715_s16 = int_to_ptr.hbm [resolvable:$true] %s714_s16 }
  0x3e   : > { %v503_v12 = vmax.f32 %v405_v3, 0.0  ;;  %v408_v13 = vadd.f32 %v310_v10, %v212_v9  ;;  %v312_v16 = vld [vmem:[%s1159_s25 + $0x28] sm:$0xff]  ;;  %v504_v17 = vmax.f32 %v406_v7, 0.0  ;;  %v409_v19 = vadd.f32 %v311_v14, %v213_v11  ;;  %v215_v21 = vld [vmem:[%s1151_s8 + $0x30] sm:$0xff]  ;;  %v216_v23 = vld [vmem:[%s1151_s8 + $0x38] sm:$0xff]  ;;  %s955_s29 = sshra.s32 %s715_s16, 4  ;;  %s956_s29 = int_to_ptr.hbm [resolvable:$true] %s955_s29 }
  0x3f   : > { %v505_v18 = vmax.f32 %v407_v8, 0.0  ;;  %v410_v20 = vadd.f32 %v312_v16, %v214_v15  ;;  %v313_v22 = vld [vmem:[%s1159_s25 + $0x30] sm:$0xff]  ;;  %v314_v26 = vld [vmem:[%s1159_s25 + $0x38] sm:$0xff]  ;;  %v217_v27 = vld [vmem:[%s1151_s8 + $0x40] sm:$0xff]  ;;  %s957_s3 = scalar_lea.hbm %s956_s29, 784  ;;  %p962_p2 = scmp.lt.s32.totalorder %s956_s29, %s1498_s2 }
  0x40   : > { %601 = vst [vmem:[%s1181_s19] sm:$0xff] %v503_v12  ;;  %v506_v24 = vmax.f32 %v408_v13, 0.0  ;;  %v411_v25 = vadd.f32 %v313_v22, %v215_v21  ;;  %v315_v28 = vld [vmem:[%s1159_s25 + $0x40] sm:$0xff]  ;;  %v507_v29 = vmax.f32 %v409_v19, 0.0  ;;  %v412_v31 = vadd.f32 %v314_v26, %v216_v23  ;;  %v218_v33 = vld [vmem:[%s1151_s8 + $0x48] sm:$0xff]  ;;  %v219_v35 = vld [vmem:[%s1151_s8 + $0x50] sm:$0xff]  ;;  %p958_p6 = scmp.ne.s32.totalorder %s956_s29, %s957_s3  ;;  %p963_p3 = scmp.lt.s32.totalorder %s961_s23, %s957_s3 }
  0x41   : > { %602 = vst [vmem:[%s1181_s19 + $0x8] sm:$0xff] %v504_v17  ;;  %v508_v30 = vmax.f32 %v410_v20, 0.0  ;;  %v413_v32 = vadd.f32 %v315_v28, %v217_v27  ;;  %v316_v34 = vld [vmem:[%s1159_s25 + $0x48] sm:$0xff]  ;;  %v317_v38 = vld [vmem:[%s1159_s25 + $0x50] sm:$0xff]  ;;  %v220_v39 = vld [vmem:[%s1151_s8 + $0x58] sm:$0xff] }
  0x42   : > { %603 = vst [vmem:[%s1181_s19 + $0x10] sm:$0xff] %v505_v18  ;;  %v509_v36 = vmax.f32 %v411_v25, 0.0  ;;  %v414_v37 = vadd.f32 %v316_v34, %v218_v33  ;;  %v318_v40 = vld [vmem:[%s1159_s25 + $0x58] sm:$0xff]  ;;  %v510_v41 = vmax.f32 %v412_v31, 0.0  ;;  %v415_v42 = vadd.f32 %v317_v38, %v219_v35  ;;  %v221_v44 = vld [vmem:[%s1151_s8 + $0x60] sm:$0xff]  ;;  %v222_v46 = vld [vmem:[%s1151_s8 + $0x68] sm:$0xff]  ;;  %p959_p13 = pnand %p958_p6, %p1078_p11  ;;  %p964_p4 = por %p963_p3, %p962_p2 }
  0x43   : > { %604 = vst [vmem:[%s1181_s19 + $0x18] sm:$0xff] %v506_v24  ;;  %v416_v43 = vadd.f32 %v318_v40, %v220_v39  ;;  %v319_v45 = vld [vmem:[%s1159_s25 + $0x60] sm:$0xff]  ;;  %v511_v47 = vmax.f32 %v413_v32, 0.0  ;;  %v320_v49 = vld [vmem:[%s1159_s25 + $0x68] sm:$0xff]  ;;  %v223_v50 = vld [vmem:[%s1151_s8 + $0x70] sm:$0xff] }
  0x44   : > { %605 = vst [vmem:[%s1181_s19 + $0x20] sm:$0xff] %v507_v29  ;;  %v417_v48 = vadd.f32 %v319_v45, %v221_v44  ;;  %v321_v51 = vld [vmem:[%s1159_s25 + $0x70] sm:$0xff]  ;;  %v512_v52 = vmax.f32 %v414_v37, 0.0  ;;  %v418_v53 = vadd.f32 %v320_v49, %v222_v46  ;;  %v224_v54 = vld [vmem:[%s1151_s8 + $0x78] sm:$0xff]  ;;  %v225_v56 = vld [vmem:[%s1151_s8 + $0x80] sm:$0xff]  ;;  %v513_v57 = vmax.f32 %v415_v42, 0.0  ;;  %p960_p1 = pneg %p959_p13 }
  0x45   : > { %606 = vst [vmem:[%s1181_s19 + $0x28] sm:$0xff] %v508_v30  ;;  %v322_v55 = vld [vmem:[%s1159_s25 + $0x78] sm:$0xff]  ;;  %v419_v58 = vadd.f32 %v321_v51, %v223_v50  ;;  %v323_v59 = vld [vmem:[%s1159_s25 + $0x80] sm:$0xff]  ;;  %v226_v60 = vld [vmem:[%s1151_s8 + $0x88] sm:$0xff]  ;;  %v514_v62 = vmax.f32 %v416_v43, 0.0 }
  0x46   : > { %607 = vst [vmem:[%s1181_s19 + $0x30] sm:$0xff] %v509_v36  ;;  %v324_v61 = vld [vmem:[%s1159_s25 + $0x88] sm:$0xff]  ;;  %v420_v63 = vadd.f32 %v322_v55, %v224_v54  ;;  %v227_v0 = vld [vmem:[%s1151_s8 + $0x90] sm:$0xff]  ;;  %v515_v2 = vmax.f32 %v417_v48, 0.0  ;;  %v421_v3 = vadd.f32 %v323_v59, %v225_v56  ;;  %v228_v4 = vld [vmem:[%s1151_s8 + $0x98] sm:$0xff]  ;;  %v516_v6 = vmax.f32 %v418_v53, 0.0  ;;  %p965_p5 = pnand %p964_p4, %p960_p1 }
  0x47   : > { %608 = vst [vmem:[%s1181_s19 + $0x38] sm:$0xff] %v510_v41  ;;  %v325_v1 = vld [vmem:[%s1159_s25 + $0x90] sm:$0xff]  ;;  %v326_v5 = vld [vmem:[%s1159_s25 + $0x98] sm:$0xff]  ;;  %v422_v7 = vadd.f32 %v324_v61, %v226_v60  ;;  %v229_v8 = vld [vmem:[%s1151_s8 + $0xa0] sm:$0xff]  ;;  %v517_v10 = vmax.f32 %v419_v58, 0.0 }
  0x48   : > { %609 = vst [vmem:[%s1181_s19 + $0x40] sm:$0xff] %v511_v47  ;;  %v327_v9 = vld [vmem:[%s1159_s25 + $0xa0] sm:$0xff]  ;;  %v423_v11 = vadd.f32 %v325_v1, %v227_v0  ;;  %v230_v12 = vld [vmem:[%s1151_s8 + $0xa8] sm:$0xff]  ;;  %v518_v14 = vmax.f32 %v420_v63, 0.0  ;;  %v424_v15 = vadd.f32 %v326_v5, %v228_v4  ;;  %v231_v16 = vld [vmem:[%s1151_s8 + $0xb0] sm:$0xff]  ;;  %v519_v18 = vmax.f32 %v421_v3, 0.0 }
  0x49   : > { %610 = vst [vmem:[%s1181_s19 + $0x48] sm:$0xff] %v512_v52  ;;  %v328_v13 = vld [vmem:[%s1159_s25 + $0xa8] sm:$0xff]  ;;  %v329_v17 = vld [vmem:[%s1159_s25 + $0xb0] sm:$0xff]  ;;  %v425_v19 = vadd.f32 %v327_v9, %v229_v8  ;;  %v232_v20 = vld [vmem:[%s1151_s8 + $0xb8] sm:$0xff]  ;;  %v520_v22 = vmax.f32 %v422_v7, 0.0 }
  0x4a   : > { %611 = vst [vmem:[%s1181_s19 + $0x50] sm:$0xff] %v513_v57  ;;  %v330_v21 = vld [vmem:[%s1159_s25 + $0xb8] sm:$0xff]  ;;  %v426_v23 = vadd.f32 %v328_v13, %v230_v12  ;;  %v233_v24 = vld [vmem:[%s1151_s8 + $0xc0] sm:$0xff]  ;;  %v521_v26 = vmax.f32 %v423_v11, 0.0  ;;  %v427_v27 = vadd.f32 %v329_v17, %v231_v16  ;;  %v234_v28 = vld [vmem:[%s1151_s8 + $0xc8] sm:$0xff]  ;;  %v522_v30 = vmax.f32 %v424_v15, 0.0 }
  0x4b   : > { %612 = vst [vmem:[%s1181_s19 + $0x58] sm:$0xff] %v514_v62  ;;  %v331_v25 = vld [vmem:[%s1159_s25 + $0xc0] sm:$0xff]  ;;  %v332_v29 = vld [vmem:[%s1159_s25 + $0xc8] sm:$0xff]  ;;  %v428_v31 = vadd.f32 %v330_v21, %v232_v20  ;;  %v235_v32 = vld [vmem:[%s1151_s8 + $0xd0] sm:$0xff]  ;;  %v523_v34 = vmax.f32 %v425_v19, 0.0 }
  0x4c   : > { %613 = vst [vmem:[%s1181_s19 + $0x60] sm:$0xff] %v515_v2  ;;  %v333_v33 = vld [vmem:[%s1159_s25 + $0xd0] sm:$0xff]  ;;  %v429_v35 = vadd.f32 %v331_v25, %v233_v24  ;;  %v236_v36 = vld [vmem:[%s1151_s8 + $0xd8] sm:$0xff]  ;;  %v524_v38 = vmax.f32 %v426_v23, 0.0  ;;  %v430_v39 = vadd.f32 %v332_v29, %v234_v28  ;;  %v237_v40 = vld [vmem:[%s1151_s8 + $0xe0] sm:$0xff]  ;;  %v525_v42 = vmax.f32 %v427_v27, 0.0 }
  0x4d   : > { %614 = vst [vmem:[%s1181_s19 + $0x68] sm:$0xff] %v516_v6  ;;  %v334_v37 = vld [vmem:[%s1159_s25 + $0xd8] sm:$0xff]  ;;  %v335_v41 = vld [vmem:[%s1159_s25 + $0xe0] sm:$0xff]  ;;  %v431_v43 = vadd.f32 %v333_v33, %v235_v32  ;;  %v238_v44 = vld [vmem:[%s1151_s8 + $0xe8] sm:$0xff]  ;;  %v526_v46 = vmax.f32 %v428_v31, 0.0 }
  0x4e   : > { %615 = vst [vmem:[%s1181_s19 + $0x70] sm:$0xff] %v517_v10  ;;  %v336_v45 = vld [vmem:[%s1159_s25 + $0xe8] sm:$0xff]  ;;  %v432_v47 = vadd.f32 %v334_v37, %v236_v36  ;;  %v239_v48 = vld [vmem:[%s1151_s8 + $0xf0] sm:$0xff]  ;;  %v527_v50 = vmax.f32 %v429_v35, 0.0  ;;  %v433_v51 = vadd.f32 %v335_v41, %v237_v40  ;;  %v240_v52 = vld [vmem:[%s1151_s8 + $0xf8] sm:$0xff]  ;;  %v528_v54 = vmax.f32 %v430_v39, 0.0 }
  0x4f   : > { %616 = vst [vmem:[%s1181_s19 + $0x78] sm:$0xff] %v518_v14  ;;  %v337_v49 = vld [vmem:[%s1159_s25 + $0xf0] sm:$0xff]  ;;  %v338_v53 = vld [vmem:[%s1159_s25 + $0xf8] sm:$0xff]  ;;  %v434_v55 = vadd.f32 %v336_v45, %v238_v44  ;;  %v241_v56 = vld [vmem:[%s1151_s8 + $0x100] sm:$0xff]  ;;  %v529_v58 = vmax.f32 %v431_v43, 0.0 }
  0x50   : > { %617 = vst [vmem:[%s1181_s19 + $0x80] sm:$0xff] %v519_v18  ;;  %v339_v57 = vld [vmem:[%s1159_s25 + $0x100] sm:$0xff]  ;;  %v435_v59 = vadd.f32 %v337_v49, %v239_v48  ;;  %v242_v60 = vld [vmem:[%s1151_s8 + $0x108] sm:$0xff]  ;;  %v530_v62 = vmax.f32 %v432_v47, 0.0  ;;  %v436_v63 = vadd.f32 %v338_v53, %v240_v52  ;;  %v243_v0 = vld [vmem:[%s1151_s8 + $0x110] sm:$0xff]  ;;  %v531_v2 = vmax.f32 %v433_v51, 0.0 }
  0x51   : > { %618 = vst [vmem:[%s1181_s19 + $0x88] sm:$0xff] %v520_v22  ;;  %v340_v61 = vld [vmem:[%s1159_s25 + $0x108] sm:$0xff]  ;;  %v341_v1 = vld [vmem:[%s1159_s25 + $0x110] sm:$0xff]  ;;  %v437_v3 = vadd.f32 %v339_v57, %v241_v56  ;;  %v244_v4 = vld [vmem:[%s1151_s8 + $0x118] sm:$0xff]  ;;  %v532_v6 = vmax.f32 %v434_v55, 0.0 }
  0x52   : > { %619 = vst [vmem:[%s1181_s19 + $0x90] sm:$0xff] %v521_v26  ;;  %v342_v5 = vld [vmem:[%s1159_s25 + $0x118] sm:$0xff]  ;;  %v438_v7 = vadd.f32 %v340_v61, %v242_v60  ;;  %v245_v8 = vld [vmem:[%s1151_s8 + $0x120] sm:$0xff]  ;;  %v533_v10 = vmax.f32 %v435_v59, 0.0  ;;  %v439_v11 = vadd.f32 %v341_v1, %v243_v0  ;;  %v246_v12 = vld [vmem:[%s1151_s8 + $0x128] sm:$0xff]  ;;  %v534_v14 = vmax.f32 %v436_v63, 0.0 }
  0x53   : > { %620 = vst [vmem:[%s1181_s19 + $0x98] sm:$0xff] %v522_v30  ;;  %v343_v9 = vld [vmem:[%s1159_s25 + $0x120] sm:$0xff]  ;;  %v344_v13 = vld [vmem:[%s1159_s25 + $0x128] sm:$0xff]  ;;  %v440_v15 = vadd.f32 %v342_v5, %v244_v4  ;;  %v247_v16 = vld [vmem:[%s1151_s8 + $0x130] sm:$0xff]  ;;  %v535_v18 = vmax.f32 %v437_v3, 0.0 }
  0x54   : > { %621 = vst [vmem:[%s1181_s19 + $0xa0] sm:$0xff] %v523_v34  ;;  %v345_v17 = vld [vmem:[%s1159_s25 + $0x130] sm:$0xff]  ;;  %v441_v19 = vadd.f32 %v343_v9, %v245_v8  ;;  %v248_v20 = vld [vmem:[%s1151_s8 + $0x138] sm:$0xff]  ;;  %v536_v22 = vmax.f32 %v438_v7, 0.0  ;;  %v442_v23 = vadd.f32 %v344_v13, %v246_v12  ;;  %v249_v24 = vld [vmem:[%s1151_s8 + $0x140] sm:$0xff]  ;;  %v537_v26 = vmax.f32 %v439_v11, 0.0 }
  0x55   : > { %622 = vst [vmem:[%s1181_s19 + $0xa8] sm:$0xff] %v524_v38  ;;  %v346_v21 = vld [vmem:[%s1159_s25 + $0x138] sm:$0xff]  ;;  %v347_v25 = vld [vmem:[%s1159_s25 + $0x140] sm:$0xff]  ;;  %v443_v27 = vadd.f32 %v345_v17, %v247_v16  ;;  %v250_v28 = vld [vmem:[%s1151_s8 + $0x148] sm:$0xff]  ;;  %v538_v30 = vmax.f32 %v440_v15, 0.0 }
  0x56   : > { %623 = vst [vmem:[%s1181_s19 + $0xb0] sm:$0xff] %v525_v42  ;;  %v348_v29 = vld [vmem:[%s1159_s25 + $0x148] sm:$0xff]  ;;  %v444_v31 = vadd.f32 %v346_v21, %v248_v20  ;;  %v251_v32 = vld [vmem:[%s1151_s8 + $0x150] sm:$0xff]  ;;  %v539_v34 = vmax.f32 %v441_v19, 0.0  ;;  %v445_v35 = vadd.f32 %v347_v25, %v249_v24  ;;  %v252_v36 = vld [vmem:[%s1151_s8 + $0x158] sm:$0xff]  ;;  %v540_v38 = vmax.f32 %v442_v23, 0.0 }
  0x57   : > { %624 = vst [vmem:[%s1181_s19 + $0xb8] sm:$0xff] %v526_v46  ;;  %v349_v33 = vld [vmem:[%s1159_s25 + $0x150] sm:$0xff]  ;;  %v350_v37 = vld [vmem:[%s1159_s25 + $0x158] sm:$0xff]  ;;  %v446_v39 = vadd.f32 %v348_v29, %v250_v28  ;;  %v253_v40 = vld [vmem:[%s1151_s8 + $0x160] sm:$0xff]  ;;  %v541_v42 = vmax.f32 %v443_v27, 0.0 }
  0x58   : > { %625 = vst [vmem:[%s1181_s19 + $0xc0] sm:$0xff] %v527_v50  ;;  %v351_v41 = vld [vmem:[%s1159_s25 + $0x160] sm:$0xff]  ;;  %v447_v43 = vadd.f32 %v349_v33, %v251_v32  ;;  %v254_v44 = vld [vmem:[%s1151_s8 + $0x168] sm:$0xff]  ;;  %v542_v46 = vmax.f32 %v444_v31, 0.0  ;;  %v448_v47 = vadd.f32 %v350_v37, %v252_v36  ;;  %v255_v48 = vld [vmem:[%s1151_s8 + $0x170] sm:$0xff]  ;;  %v543_v50 = vmax.f32 %v445_v35, 0.0 }
  0x59   : > { %626 = vst [vmem:[%s1181_s19 + $0xc8] sm:$0xff] %v528_v54  ;;  %v352_v45 = vld [vmem:[%s1159_s25 + $0x168] sm:$0xff]  ;;  %v353_v49 = vld [vmem:[%s1159_s25 + $0x170] sm:$0xff]  ;;  %v449_v51 = vadd.f32 %v351_v41, %v253_v40  ;;  %v256_v52 = vld [vmem:[%s1151_s8 + $0x178] sm:$0xff]  ;;  %v544_v54 = vmax.f32 %v446_v39, 0.0 }
  0x5a   : > { %627 = vst [vmem:[%s1181_s19 + $0xd0] sm:$0xff] %v529_v58  ;;  %v354_v53 = vld [vmem:[%s1159_s25 + $0x178] sm:$0xff]  ;;  %v450_v55 = vadd.f32 %v352_v45, %v254_v44  ;;  %v257_v56 = vld [vmem:[%s1151_s8 + $0x180] sm:$0xff]  ;;  %v545_v58 = vmax.f32 %v447_v43, 0.0  ;;  %v451_v59 = vadd.f32 %v353_v49, %v255_v48  ;;  %v258_v60 = vld [vmem:[%s1151_s8 + $0x188] sm:$0xff] }
  0x5b   : > { %628 = vst [vmem:[%s1181_s19 + $0xd8] sm:$0xff] %v530_v62  ;;  %v355_v57 = vld [vmem:[%s1159_s25 + $0x180] sm:$0xff]  ;;  %v356_v61 = vld [vmem:[%s1159_s25 + $0x188] sm:$0xff]  ;;  %v546_v62 = vmax.f32 %v448_v47, 0.0  ;;  %v452_v63 = vadd.f32 %v354_v53, %v256_v52  ;;  %v259_v0 = vld [vmem:[%s1151_s8 + $0x190] sm:$0xff] }
  0x5c   : > { %629 = vst [vmem:[%s1181_s19 + $0xe0] sm:$0xff] %v531_v2  ;;  %v357_v1 = vld [vmem:[%s1159_s25 + $0x190] sm:$0xff]  ;;  %v547_v2 = vmax.f32 %v449_v51, 0.0  ;;  %v453_v3 = vadd.f32 %v355_v57, %v257_v56  ;;  %v260_v4 = vld [vmem:[%s1151_s8 + $0x198] sm:$0xff]  ;;  %v454_v7 = vadd.f32 %v356_v61, %v258_v60  ;;  %v261_v8 = vld [vmem:[%s1151_s8 + $0x1a0] sm:$0xff] }
  0x5d   : > { %630 = vst [vmem:[%s1181_s19 + $0xe8] sm:$0xff] %v532_v6  ;;  %v358_v5 = vld [vmem:[%s1159_s25 + $0x198] sm:$0xff]  ;;  %v548_v6 = vmax.f32 %v450_v55, 0.0  ;;  %v359_v9 = vld [vmem:[%s1159_s25 + $0x1a0] sm:$0xff]  ;;  %v455_v11 = vadd.f32 %v357_v1, %v259_v0  ;;  %v262_v12 = vld [vmem:[%s1151_s8 + $0x1a8] sm:$0xff] }
  0x5e   : > { %631 = vst [vmem:[%s1181_s19 + $0xf0] sm:$0xff] %v533_v10  ;;  %v549_v10 = vmax.f32 %v451_v59, 0.0  ;;  %v360_v13 = vld [vmem:[%s1159_s25 + $0x1a8] sm:$0xff]  ;;  %v456_v15 = vadd.f32 %v358_v5, %v260_v4  ;;  %v263_v16 = vld [vmem:[%s1151_s8 + $0x1b0] sm:$0xff]  ;;  %v457_v19 = vadd.f32 %v359_v9, %v261_v8  ;;  %v264_v20 = vld [vmem:[%s1151_s8 + $0x1b8] sm:$0xff] }
  0x5f   : > { %632 = vst [vmem:[%s1181_s19 + $0xf8] sm:$0xff] %v534_v14  ;;  %v550_v14 = vmax.f32 %v452_v63, 0.0  ;;  %v361_v17 = vld [vmem:[%s1159_s25 + $0x1b0] sm:$0xff]  ;;  %v362_v21 = vld [vmem:[%s1159_s25 + $0x1b8] sm:$0xff]  ;;  %v458_v23 = vadd.f32 %v360_v13, %v262_v12  ;;  %v265_v24 = vld [vmem:[%s1151_s8 + $0x1c0] sm:$0xff] }
  0x60   : > { %633 = vst [vmem:[%s1181_s19 + $0x100] sm:$0xff] %v535_v18  ;;  %v551_v18 = vmax.f32 %v453_v3, 0.0  ;;  %v363_v25 = vld [vmem:[%s1159_s25 + $0x1c0] sm:$0xff]  ;;  %v459_v27 = vadd.f32 %v361_v17, %v263_v16  ;;  %v266_v28 = vld [vmem:[%s1151_s8 + $0x1c8] sm:$0xff]  ;;  %v460_v31 = vadd.f32 %v362_v21, %v264_v20  ;;  %v267_v32 = vld [vmem:[%s1151_s8 + $0x1d0] sm:$0xff] }
  0x61   : > { %634 = vst [vmem:[%s1181_s19 + $0x108] sm:$0xff] %v536_v22  ;;  %v552_v22 = vmax.f32 %v454_v7, 0.0  ;;  %v364_v29 = vld [vmem:[%s1159_s25 + $0x1c8] sm:$0xff]  ;;  %v365_v33 = vld [vmem:[%s1159_s25 + $0x1d0] sm:$0xff]  ;;  %v461_v35 = vadd.f32 %v363_v25, %v265_v24  ;;  %v268_v36 = vld [vmem:[%s1151_s8 + $0x1d8] sm:$0xff] }
  0x62   : > { %635 = vst [vmem:[%s1181_s19 + $0x110] sm:$0xff] %v537_v26  ;;  %v553_v26 = vmax.f32 %v455_v11, 0.0  ;;  %v366_v37 = vld [vmem:[%s1159_s25 + $0x1d8] sm:$0xff]  ;;  %v462_v39 = vadd.f32 %v364_v29, %v266_v28  ;;  %v269_v40 = vld [vmem:[%s1151_s8 + $0x1e0] sm:$0xff]  ;;  %v463_v43 = vadd.f32 %v365_v33, %v267_v32  ;;  %v270_v44 = vld [vmem:[%s1151_s8 + $0x1e8] sm:$0xff] }
  0x63   : > { %636 = vst [vmem:[%s1181_s19 + $0x118] sm:$0xff] %v538_v30  ;;  %v554_v30 = vmax.f32 %v456_v15, 0.0  ;;  %v367_v41 = vld [vmem:[%s1159_s25 + $0x1e0] sm:$0xff]  ;;  %v368_v45 = vld [vmem:[%s1159_s25 + $0x1e8] sm:$0xff]  ;;  %v464_v47 = vadd.f32 %v366_v37, %v268_v36  ;;  %v271_v48 = vld [vmem:[%s1151_s8 + $0x1f0] sm:$0xff] }
  0x64   : > { %637 = vst [vmem:[%s1181_s19 + $0x120] sm:$0xff] %v539_v34  ;;  %v555_v34 = vmax.f32 %v457_v19, 0.0  ;;  %v369_v49 = vld [vmem:[%s1159_s25 + $0x1f0] sm:$0xff]  ;;  %v465_v51 = vadd.f32 %v367_v41, %v269_v40  ;;  %v272_v52 = vld [vmem:[%s1151_s8 + $0x1f8] sm:$0xff]  ;;  %v466_v55 = vadd.f32 %v368_v45, %v270_v44  ;;  %v273_v56 = vld [vmem:[%s1151_s8 + $0x200] sm:$0xff] }
  0x65   : > { %638 = vst [vmem:[%s1181_s19 + $0x128] sm:$0xff] %v540_v38  ;;  %v556_v38 = vmax.f32 %v458_v23, 0.0  ;;  %v370_v53 = vld [vmem:[%s1159_s25 + $0x1f8] sm:$0xff]  ;;  %v371_v57 = vld [vmem:[%s1159_s25 + $0x200] sm:$0xff]  ;;  %v467_v59 = vadd.f32 %v369_v49, %v271_v48  ;;  %v274_v60 = vld [vmem:[%s1151_s8 + $0x208] sm:$0xff] }
  0x66   : > { %639 = vst [vmem:[%s1181_s19 + $0x130] sm:$0xff] %v541_v42  ;;  %v557_v42 = vmax.f32 %v459_v27, 0.0  ;;  %v372_v61 = vld [vmem:[%s1159_s25 + $0x208] sm:$0xff]  ;;  %v468_v63 = vadd.f32 %v370_v53, %v272_v52  ;;  %v275_v0 = vld [vmem:[%s1151_s8 + $0x210] sm:$0xff]  ;;  %v469_v3 = vadd.f32 %v371_v57, %v273_v56  ;;  %v276_v4 = vld [vmem:[%s1151_s8 + $0x218] sm:$0xff] }
  0x67   : > { %640 = vst [vmem:[%s1181_s19 + $0x138] sm:$0xff] %v542_v46  ;;  %v558_v46 = vmax.f32 %v460_v31, 0.0  ;;  %v373_v1 = vld [vmem:[%s1159_s25 + $0x210] sm:$0xff]  ;;  %v374_v5 = vld [vmem:[%s1159_s25 + $0x218] sm:$0xff]  ;;  %v470_v7 = vadd.f32 %v372_v61, %v274_v60  ;;  %v277_v8 = vld [vmem:[%s1151_s8 + $0x220] sm:$0xff] }
  0x68   : > { %641 = vst [vmem:[%s1181_s19 + $0x140] sm:$0xff] %v543_v50  ;;  %v559_v50 = vmax.f32 %v461_v35, 0.0  ;;  %v375_v9 = vld [vmem:[%s1159_s25 + $0x220] sm:$0xff]  ;;  %v471_v11 = vadd.f32 %v373_v1, %v275_v0  ;;  %v278_v12 = vld [vmem:[%s1151_s8 + $0x228] sm:$0xff]  ;;  %v472_v15 = vadd.f32 %v374_v5, %v276_v4  ;;  %v279_v16 = vld [vmem:[%s1151_s8 + $0x230] sm:$0xff] }
  0x69   : > { %642 = vst [vmem:[%s1181_s19 + $0x148] sm:$0xff] %v544_v54  ;;  %v560_v54 = vmax.f32 %v462_v39, 0.0  ;;  %v376_v13 = vld [vmem:[%s1159_s25 + $0x228] sm:$0xff]  ;;  %v377_v17 = vld [vmem:[%s1159_s25 + $0x230] sm:$0xff]  ;;  %v473_v19 = vadd.f32 %v375_v9, %v277_v8  ;;  %v280_v20 = vld [vmem:[%s1151_s8 + $0x238] sm:$0xff] }
  0x6a   : > { %643 = vst [vmem:[%s1181_s19 + $0x150] sm:$0xff] %v545_v58  ;;  %v561_v58 = vmax.f32 %v463_v43, 0.0  ;;  %v378_v21 = vld [vmem:[%s1159_s25 + $0x238] sm:$0xff]  ;;  %v474_v23 = vadd.f32 %v376_v13, %v278_v12  ;;  %v281_v24 = vld [vmem:[%s1151_s8 + $0x240] sm:$0xff]  ;;  %v475_v27 = vadd.f32 %v377_v17, %v279_v16  ;;  %v282_v28 = vld [vmem:[%s1151_s8 + $0x248] sm:$0xff] }
  0x6b   : > { %644 = vst [vmem:[%s1181_s19 + $0x158] sm:$0xff] %v546_v62  ;;  %v562_v62 = vmax.f32 %v464_v47, 0.0  ;;  %v379_v25 = vld [vmem:[%s1159_s25 + $0x240] sm:$0xff]  ;;  %v380_v29 = vld [vmem:[%s1159_s25 + $0x248] sm:$0xff]  ;;  %v476_v31 = vadd.f32 %v378_v21, %v280_v20  ;;  %v283_v32 = vld [vmem:[%s1151_s8 + $0x250] sm:$0xff] }
  0x6c   : > { %645 = vst [vmem:[%s1181_s19 + $0x160] sm:$0xff] %v547_v2  ;;  %v563_v2 = vmax.f32 %v465_v51, 0.0  ;;  %v381_v33 = vld [vmem:[%s1159_s25 + $0x250] sm:$0xff]  ;;  %v477_v35 = vadd.f32 %v379_v25, %v281_v24  ;;  %v284_v36 = vld [vmem:[%s1151_s8 + $0x258] sm:$0xff]  ;;  %v478_v39 = vadd.f32 %v380_v29, %v282_v28  ;;  %v285_v40 = vld [vmem:[%s1151_s8 + $0x260] sm:$0xff] }
  0x6d   : > { %646 = vst [vmem:[%s1181_s19 + $0x168] sm:$0xff] %v548_v6  ;;  %v564_v6 = vmax.f32 %v466_v55, 0.0  ;;  %v382_v37 = vld [vmem:[%s1159_s25 + $0x258] sm:$0xff]  ;;  %v383_v41 = vld [vmem:[%s1159_s25 + $0x260] sm:$0xff]  ;;  %v479_v43 = vadd.f32 %v381_v33, %v283_v32  ;;  %v286_v44 = vld [vmem:[%s1151_s8 + $0x268] sm:$0xff] }
  0x6e   : > { %647 = vst [vmem:[%s1181_s19 + $0x170] sm:$0xff] %v549_v10  ;;  %v565_v10 = vmax.f32 %v467_v59, 0.0  ;;  %v384_v45 = vld [vmem:[%s1159_s25 + $0x268] sm:$0xff]  ;;  %v480_v47 = vadd.f32 %v382_v37, %v284_v36  ;;  %v287_v48 = vld [vmem:[%s1151_s8 + $0x270] sm:$0xff]  ;;  %v481_v51 = vadd.f32 %v383_v41, %v285_v40  ;;  %v288_v52 = vld [vmem:[%s1151_s8 + $0x278] sm:$0xff] }
  0x6f   : > { %648 = vst [vmem:[%s1181_s19 + $0x178] sm:$0xff] %v550_v14  ;;  %v566_v14 = vmax.f32 %v468_v63, 0.0  ;;  %v385_v49 = vld [vmem:[%s1159_s25 + $0x270] sm:$0xff]  ;;  %v386_v53 = vld [vmem:[%s1159_s25 + $0x278] sm:$0xff]  ;;  %v482_v55 = vadd.f32 %v384_v45, %v286_v44  ;;  %v289_v56 = vld [vmem:[%s1151_s8 + $0x280] sm:$0xff] }
  0x70   : > { %649 = vst [vmem:[%s1181_s19 + $0x180] sm:$0xff] %v551_v18  ;;  %v567_v18 = vmax.f32 %v469_v3, 0.0  ;;  %v387_v57 = vld [vmem:[%s1159_s25 + $0x280] sm:$0xff]  ;;  %v483_v59 = vadd.f32 %v385_v49, %v287_v48  ;;  %v290_v60 = vld [vmem:[%s1151_s8 + $0x288] sm:$0xff]  ;;  %v484_v63 = vadd.f32 %v386_v53, %v288_v52  ;;  %v291_v0 = vld [vmem:[%s1151_s8 + $0x290] sm:$0xff] }
  0x71   : > { %650 = vst [vmem:[%s1181_s19 + $0x188] sm:$0xff] %v552_v22  ;;  %v568_v22 = vmax.f32 %v470_v7, 0.0  ;;  %v388_v61 = vld [vmem:[%s1159_s25 + $0x288] sm:$0xff]  ;;  %v389_v1 = vld [vmem:[%s1159_s25 + $0x290] sm:$0xff]  ;;  %v485_v3 = vadd.f32 %v387_v57, %v289_v56  ;;  %v292_v4 = vld [vmem:[%s1151_s8 + $0x298] sm:$0xff] }
  0x72   : > { %651 = vst [vmem:[%s1181_s19 + $0x190] sm:$0xff] %v553_v26  ;;  %v569_v26 = vmax.f32 %v471_v11, 0.0  ;;  %v390_v5 = vld [vmem:[%s1159_s25 + $0x298] sm:$0xff]  ;;  %v486_v7 = vadd.f32 %v388_v61, %v290_v60  ;;  %v293_v8 = vld [vmem:[%s1151_s8 + $0x2a0] sm:$0xff]  ;;  %v487_v11 = vadd.f32 %v389_v1, %v291_v0  ;;  %v294_v12 = vld [vmem:[%s1151_s8 + $0x2a8] sm:$0xff] }
  0x73   : > { %652 = vst [vmem:[%s1181_s19 + $0x198] sm:$0xff] %v554_v30  ;;  %v570_v30 = vmax.f32 %v472_v15, 0.0  ;;  %v391_v9 = vld [vmem:[%s1159_s25 + $0x2a0] sm:$0xff]  ;;  %v392_v13 = vld [vmem:[%s1159_s25 + $0x2a8] sm:$0xff]  ;;  %v488_v15 = vadd.f32 %v390_v5, %v292_v4  ;;  %v295_v16 = vld [vmem:[%s1151_s8 + $0x2b0] sm:$0xff] }
  0x74   : > { %653 = vst [vmem:[%s1181_s19 + $0x1a0] sm:$0xff] %v555_v34  ;;  %v571_v34 = vmax.f32 %v473_v19, 0.0  ;;  %v393_v17 = vld [vmem:[%s1159_s25 + $0x2b0] sm:$0xff]  ;;  %v489_v19 = vadd.f32 %v391_v9, %v293_v8  ;;  %v296_v20 = vld [vmem:[%s1151_s8 + $0x2b8] sm:$0xff]  ;;  %v297_v24 = vld [vmem:[%s1151_s8 + $0x2c0] sm:$0xff] }
  0x75   : > { %654 = vst [vmem:[%s1181_s19 + $0x1a8] sm:$0xff] %v556_v38  ;;  %v572_v38 = vmax.f32 %v474_v23, 0.0  ;;  %v394_v21 = vld [vmem:[%s1159_s25 + $0x2b8] sm:$0xff]  ;;  %v490_v23 = vadd.f32 %v392_v13, %v294_v12  ;;  %v395_v25 = vld [vmem:[%s1159_s25 + $0x2c0] sm:$0xff]  ;;  %v298_v28 = vld [vmem:[%s1151_s8 + $0x2c8] sm:$0xff] }
  0x76   : > { %655 = vst [vmem:[%s1181_s19 + $0x1b0] sm:$0xff] %v557_v42  ;;  %v573_v42 = vmax.f32 %v475_v27, 0.0  ;;  %v491_v27 = vadd.f32 %v393_v17, %v295_v16  ;;  %v396_v29 = vld [vmem:[%s1159_s25 + $0x2c8] sm:$0xff]  ;;  %v299_v32 = vld [vmem:[%s1151_s8 + $0x2d0] sm:$0xff]  ;;  %v300_v36 = vld [vmem:[%s1151_s8 + $0x2d8] sm:$0xff] }
  0x77   : > { %656 = vst [vmem:[%s1181_s19 + $0x1b8] sm:$0xff] %v558_v46  ;;  %v574_v46 = vmax.f32 %v476_v31, 0.0  ;;  %v492_v31 = vadd.f32 %v394_v21, %v296_v20  ;;  %v397_v33 = vld [vmem:[%s1159_s25 + $0x2d0] sm:$0xff]  ;;  %v398_v37 = vld [vmem:[%s1159_s25 + $0x2d8] sm:$0xff]  ;;  %v301_v40 = vld [vmem:[%s1151_s8 + $0x2e0] sm:$0xff] }
  0x78   : > { %657 = vst [vmem:[%s1181_s19 + $0x1c0] sm:$0xff] %v559_v50  ;;  %v575_v50 = vmax.f32 %v477_v35, 0.0  ;;  %v493_v35 = vadd.f32 %v395_v25, %v297_v24  ;;  %v399_v41 = vld [vmem:[%s1159_s25 + $0x2e0] sm:$0xff]  ;;  %v302_v44 = vld [vmem:[%s1151_s8 + $0x2e8] sm:$0xff]  ;;  %v303_v48 = vld [vmem:[%s1151_s8 + $0x2f0] sm:$0xff] }
  0x79   : > { %658 = vst [vmem:[%s1181_s19 + $0x1c8] sm:$0xff] %v560_v54  ;;  %v576_v54 = vmax.f32 %v478_v39, 0.0  ;;  %v494_v39 = vadd.f32 %v396_v29, %v298_v28  ;;  %v400_v45 = vld [vmem:[%s1159_s25 + $0x2e8] sm:$0xff]  ;;  %v401_v49 = vld [vmem:[%s1159_s25 + $0x2f0] sm:$0xff]  ;;  %v304_v52 = vld [vmem:[%s1151_s8 + $0x2f8] sm:$0xff] }
  0x7a   : > { %659 = vst [vmem:[%s1181_s19 + $0x1d0] sm:$0xff] %v561_v58  ;;  %v577_v58 = vmax.f32 %v479_v43, 0.0  ;;  %v495_v43 = vadd.f32 %v397_v33, %v299_v32  ;;  %v402_v53 = vld [vmem:[%s1159_s25 + $0x2f8] sm:$0xff]  ;;  %v305_v56 = vld [vmem:[%s1151_s8 + $0x300] sm:$0xff]  ;;  %v306_v60 = vld [vmem:[%s1151_s8 + $0x308] sm:$0xff] }
  0x7b   : > { %660 = vst [vmem:[%s1181_s19 + $0x1d8] sm:$0xff] %v562_v62  ;;  %v578_v62 = vmax.f32 %v480_v47, 0.0  ;;  %v496_v47 = vadd.f32 %v398_v37, %v300_v36  ;;  %v403_v57 = vld [vmem:[%s1159_s25 + $0x300] sm:$0xff]  ;;  %v404_v61 = vld [vmem:[%s1159_s25 + $0x308] sm:$0xff] }
  0x7c   : > { %661 = vst [vmem:[%s1181_s19 + $0x1e0] sm:$0xff] %v563_v2  ;;  %v579_v2 = vmax.f32 %v481_v51, 0.0  ;;  %v497_v51 = vadd.f32 %v399_v41, %v301_v40  ;;  %v501_v1 = vadd.f32 %v403_v57, %v305_v56 }
  0x7d   : > { %662 = vst [vmem:[%s1181_s19 + $0x1e8] sm:$0xff] %v564_v6  ;;  %v580_v6 = vmax.f32 %v482_v55, 0.0  ;;  %v498_v55 = vadd.f32 %v400_v45, %v302_v44 }
  0x7e   : > { %663 = vst [vmem:[%s1181_s19 + $0x1f0] sm:$0xff] %v565_v10  ;;  %v581_v10 = vmax.f32 %v483_v59, 0.0  ;;  %v499_v59 = vadd.f32 %v401_v49, %v303_v48  ;;  %v595_v0 = vmax.f32 %v497_v51, 0.0 }
  0x7f   : > { %664 = vst [vmem:[%s1181_s19 + $0x1f8] sm:$0xff] %v566_v14  ;;  %v582_v14 = vmax.f32 %v484_v63, 0.0  ;;  %v500_v63 = vadd.f32 %v402_v53, %v304_v52 }
  0x80   : > { %665 = vst [vmem:[%s1181_s19 + $0x200] sm:$0xff] %v567_v18  ;;  %v583_v18 = vmax.f32 %v485_v3, 0.0  ;;  %v502_v3 = vadd.f32 %v404_v61, %v306_v60  ;;  %v597_v4 = vmax.f32 %v499_v59, 0.0 }
  0x81   : > { %666 = vst [vmem:[%s1181_s19 + $0x208] sm:$0xff] %v568_v22  ;;  %v584_v22 = vmax.f32 %v486_v7, 0.0  ;;  %v598_v5 = vmax.f32 %v500_v63, 0.0 }
  0x82   : > { %667 = vst [vmem:[%s1181_s19 + $0x210] sm:$0xff] %v569_v26  ;;  %v585_v26 = vmax.f32 %v487_v11, 0.0  ;;  %v600_v7 = vmax.f32 %v502_v3, 0.0 }
  0x83   : > { %668 = vst [vmem:[%s1181_s19 + $0x218] sm:$0xff] %v570_v30  ;;  %v586_v30 = vmax.f32 %v488_v15, 0.0 }
  0x84   : > { %669 = vst [vmem:[%s1181_s19 + $0x220] sm:$0xff] %v571_v34  ;;  %v587_v34 = vmax.f32 %v489_v19, 0.0 }
  0x85   : > { %670 = vst [vmem:[%s1181_s19 + $0x228] sm:$0xff] %v572_v38  ;;  %v588_v38 = vmax.f32 %v490_v23, 0.0 }
  0x86   : > { %671 = vst [vmem:[%s1181_s19 + $0x230] sm:$0xff] %v573_v42  ;;  %v589_v42 = vmax.f32 %v491_v27, 0.0 }
  0x87   : > { %672 = vst [vmem:[%s1181_s19 + $0x238] sm:$0xff] %v574_v46  ;;  %v590_v46 = vmax.f32 %v492_v31, 0.0 }
  0x88   : > { %673 = vst [vmem:[%s1181_s19 + $0x240] sm:$0xff] %v575_v50  ;;  %v591_v50 = vmax.f32 %v493_v35, 0.0 }
  0x89   : > { %674 = vst [vmem:[%s1181_s19 + $0x248] sm:$0xff] %v576_v54  ;;  %v592_v54 = vmax.f32 %v494_v39, 0.0 }
  0x8a   : > { %675 = vst [vmem:[%s1181_s19 + $0x250] sm:$0xff] %v577_v58  ;;  %v593_v58 = vmax.f32 %v495_v43, 0.0 }
  0x8b   : > { %676 = vst [vmem:[%s1181_s19 + $0x258] sm:$0xff] %v578_v62  ;;  %v594_v62 = vmax.f32 %v496_v47, 0.0 }
  0x8c   : > { %677 = vst [vmem:[%s1181_s19 + $0x260] sm:$0xff] %v579_v2  ;;  %v596_v2 = vmax.f32 %v498_v55, 0.0 }
  0x8d   : > { %678 = vst [vmem:[%s1181_s19 + $0x268] sm:$0xff] %v580_v6  ;;  %v599_v6 = vmax.f32 %v501_v1, 0.0 }
  0x8e   : > { %679 = vst [vmem:[%s1181_s19 + $0x270] sm:$0xff] %v581_v10 }
  0x8f   : > { %680 = vst [vmem:[%s1181_s19 + $0x278] sm:$0xff] %v582_v14 }
  0x90   : > { %681 = vst [vmem:[%s1181_s19 + $0x280] sm:$0xff] %v583_v18 }
  0x91   : > { %682 = vst [vmem:[%s1181_s19 + $0x288] sm:$0xff] %v584_v22 }
  0x92   : > { %683 = vst [vmem:[%s1181_s19 + $0x290] sm:$0xff] %v585_v26 }
  0x93   : > { %684 = vst [vmem:[%s1181_s19 + $0x298] sm:$0xff] %v586_v30 }
  0x94   : > { %685 = vst [vmem:[%s1181_s19 + $0x2a0] sm:$0xff] %v587_v34 }
  0x95   : > { %686 = vst [vmem:[%s1181_s19 + $0x2a8] sm:$0xff] %v588_v38 }
  0x96   : > { %687 = vst [vmem:[%s1181_s19 + $0x2b0] sm:$0xff] %v589_v42 }
  0x97   : > { %688 = vst [vmem:[%s1181_s19 + $0x2b8] sm:$0xff] %v590_v46 }
  0x98   : > { %689 = vst [vmem:[%s1181_s19 + $0x2c0] sm:$0xff] %v591_v50 }
  0x99   : > { %690 = vst [vmem:[%s1181_s19 + $0x2c8] sm:$0xff] %v592_v54 }
  0x9a   : > { %691 = vst [vmem:[%s1181_s19 + $0x2d0] sm:$0xff] %v593_v58 }
  0x9b   : > { %692 = vst [vmem:[%s1181_s19 + $0x2d8] sm:$0xff] %v594_v62 }
  0x9c   : > { %693 = vst [vmem:[%s1181_s19 + $0x2e0] sm:$0xff] %v595_v0 }
  0x9d   : > { %694 = vst [vmem:[%s1181_s19 + $0x2e8] sm:$0xff] %v596_v2 }
  0x9e   : > { %695 = vst [vmem:[%s1181_s19 + $0x2f0] sm:$0xff] %v597_v4 }
  0x9f   : > { %696 = vst [vmem:[%s1181_s19 + $0x2f8] sm:$0xff] %v598_v5 }
  0xa0   : > { %697 = vst [vmem:[%s1181_s19 + $0x300] sm:$0xff] %v599_v6 }
  0xa1   : > { %698 = vst [vmem:[%s1181_s19 + $0x308] sm:$0xff] %v600_v7 }
  0xa2   : > { %968 = shalt.err (!%p965_p5)
}
  0xa3   : > { %s1015_s22 = smov 128   ;;  %s1016_s6 = smov 8  }
  0xa4   : > { %830 = dma.vmem_to_hbm [thread:$0]  (%p1078_p11), %s713_s14, 12544, %s715_s16, %s700_s17, %s1015_s22, %s1015_s22, %s1016_s6  }
  0xa5 PF: > { %s729_s8 = sand.u32 1, %s999_s9   ;;  %p840_p7 = pnand %p813_p9, %p1082_p12 }
  0xa6   : > { %s730_s28 = scalar_lea.sflag [#allocation4], %s729_s8 }
  0xa7   : > { %p841_p8 = pneg %p840_p7 }
  0xa9   : > { %994 = dma.done.wait (%p841_p8), %s730_s28, 12544  }
  0xaa   : > { %996 = vsyncadd (%p841_p8), %s730_s28, 4294954752  ;;  %p18_p10 = scmp.ge.s32.totalorder %s1057_s15, 4   ;;  %s1504_s9 = smov %s1003_s10 }
  0xab   : > { %s1505_s10 = smov %s1007_s11  ;;  %s1506_s11 = smov %s1069_s18 }
  0xac   : > { %s1507_s12 = smov %s1057_s15  ;;  %20 = sbr.rel (!%p18_p10) target bundleno = 7 (0x7), region = 86 }
  0xb1   :  { %736 = vsyncpa [#allocation3], 1 }
  0xb2   :  { %738 = vsyncpa [#allocation3 + $0x1], 1 }
  0xb3   :  { %739 = vsyncpa [#allocation6], 1 }
  0xb4   :  { %741 = vsyncpa [#allocation6 + $0x1], 1 }
  0xb5   :  { %742 = vsyncpa [#allocation4], 1 }
  0xb6   :  { %744 = vsyncpa [#allocation4 + $0x1], 1 }

</bundles_post_ra>
